<compile_context>
chip_gen: v5e
topology: v5e:2x2
jax: 0.10.0
libtpu: 0.0.40
codegen_flags: <defaults>
</compile_context>

<pallas_src>
import functools
import math

import numpy as np
import jax
import jax.numpy as jnp
from jax.experimental import pallas as pl
from jax.experimental.pallas import tpu as pltpu  # noqa: F401  (kernels are single-block, fully VMEM resident; no TPU-specific grid specs needed)

# ----------------------------------------------------------------------------
# DenseNet169 configuration
# ----------------------------------------------------------------------------
BN_EPS = 1e-5
GROWTH_RATE = 32
BN_SIZE = 4
NUM_INIT_FEATURES = 64
BLOCK_CONFIG = (6, 12, 32, 32)          # densenet169
K_BUCKET = 256                          # 1x1-conv K dims padded to a multiple of
                                        # this -> only a handful of compiled shapes


def _round_up(x, m):
    return ((x + m - 1) // m) * m


# ----------------------------------------------------------------------------
# Pallas kernels
# ----------------------------------------------------------------------------
def _make_mm_kernel(prologue, epilogue):
    """Fully VMEM-resident matmul with optional fused BN+ReLU.

    prologue: BN+ReLU applied per-K-column to A before the dot (conv input BN).
    epilogue: BN+ReLU applied per-N-column to the output   (conv output BN).
    bf16 MXU inputs, f32 accumulation, bf16 store.
    """
    def kernel(*refs):
        a_ref, b_ref = refs[0], refs[1]
        i = 2
        a = a_ref[...]
        if prologue:
            scale, shift = refs[i][...], refs[i + 1][...]
            i += 2
            a = jnp.maximum(a.astype(jnp.float32) * scale + shift, 0.0)
        y = jnp.dot(a.astype(jnp.bfloat16), b_ref[...],
                    preferred_element_type=jnp.float32)
        if epilogue:
            scale, shift = refs[i][...], refs[i + 1][...]
            i += 2
            y = jnp.maximum(y * scale + shift, 0.0)
        o_ref = refs[i]
        o_ref[...] = y.astype(o_ref.dtype)
    return kernel


@jax.jit
def _pallas_conv_mm(a, b, pro, epi):
    """a:(M,K) bf16, b:(K,N) bf16, pro/epi: None or ((1,K)/(1,N) f32 scale, shift).

    No grid / no BlockSpec tiling: every conv of this net (32x32 input, batch 2)
    fits entirely in VMEM, so a single-step kernel avoids all per-step pipeline
    overhead.  jax.jit caches one compiled variant per (shape, fusion) combo.
    """
    args = [a, b]
    if pro is not None:
        args += [pro[0], pro[1]]
    if epi is not None:
        args += [epi[0], epi[1]]
    m, n = a.shape[0], b.shape[1]
    return pl.pallas_call(
        _make_mm_kernel(pro is not None, epi is not None),
        out_shape=jax.ShapeDtypeStruct((m, n), jnp.bfloat16),
    )(*args)


def _window_max_kernel(x_ref, o_ref):
    o_ref[...] = jnp.max(x_ref[...].astype(jnp.float32), axis=1).astype(o_ref.dtype)


def _window_mean_kernel(x_ref, o_ref):
    o_ref[...] = jnp.mean(x_ref[...].astype(jnp.float32), axis=1).astype(o_ref.dtype)


@functools.partial(jax.jit, static_argnames=("op",))
def _pallas_window_reduce(x, op):
    """Pooling reduction: (M, KK, C) -> (M, C) over axis 1 (max or mean)."""
    m, _, c = x.shape
    kernel = _window_max_kernel if op == "max" else _window_mean_kernel
    return pl.pallas_call(
        kernel, out_shape=jax.ShapeDtypeStruct((m, c), x.dtype))(x)


def _head_kernel(x_ref, scale_ref, shift_ref, w_ref, b_ref, o_ref):
    """norm5 + ReLU + global average pool + Linear + Sigmoid, fused."""
    x = x_ref[...].astype(jnp.float32)                          # (N, S, C)
    x = jnp.maximum(x * scale_ref[...] + shift_ref[...], 0.0)   # BN + ReLU
    pooled = jnp.mean(x, axis=1)                                # (N, C)
    y = jnp.dot(pooled, w_ref[...],
                preferred_element_type=jnp.float32) + b_ref[...]
    o_ref[...] = 1.0 / (1.0 + jnp.exp(-y))                      # Sigmoid


@jax.jit
def _pallas_head(x, scale, shift, w, b):
    n, s, c = x.shape
    classes = w.shape[1]
    return pl.pallas_call(
        _head_kernel,
        out_shape=jax.ShapeDtypeStruct((n, classes), jnp.float32),
    )(x, scale.reshape(1, 1, c), shift.reshape(1, 1, c), w, b)


# ----------------------------------------------------------------------------
# Plain-JAX glue (patch extraction, light padding, reshapes)
# ----------------------------------------------------------------------------
def _extract_patches(x, kh, kw, stride, pad, pad_value):
    """x: (N,H,W,C) -> sliding windows (N,Ho,Wo,kh*kw,C)."""
    n, h, w, c = x.shape
    if pad > 0:
        x = jnp.pad(x, ((0, 0), (pad, pad), (pad, pad), (0, 0)),
                    constant_values=pad_value)
    hp, wp = h + 2 * pad, w + 2 * pad
    ho = (hp - kh) // stride + 1
    wo = (wp - kw) // stride + 1
    views = []
    for di in range(kh):
        for dj in range(kw):
            views.append(jax.lax.slice(
                x, (0, di, dj, 0),
                (n, di + (ho - 1) * stride + 1, dj + (wo - 1) * stride + 1, c),
                (1, stride, stride, 1)))
    return jnp.stack(views, axis=3)
    # TODO(synk): the 3x3 im2col still materializes kh*kw shifted copies in HBM;
    # folding the taps into the matmul kernel (9 accumulated shifted dots) would
    # remove that traffic.


def conv2d(x, conv, pro_bn=None, epi_bn=None):
    """Bias-free conv via im2col + fused shape-specialized Pallas matmul.

    x: NHWC bf16.
    pro_bn: BN+ReLU applied to the conv INPUT  (only legal for 1x1 convs,
            because zero padding must see post-ReLU zeros).
    epi_bn: BN+ReLU applied to the conv OUTPUT.
    """
    n, h, w, c = x.shape
    kh, kw, stride = conv["kh"], conv["kw"], conv["stride"]
    if kh == 1 and kw == 1:              # all 1x1 convs in DenseNet are stride 1
        ho, wo = h, w
        k_real = c
        a = x.reshape(n * h * w, c)
    else:
        assert pro_bn is None
        patches = _extract_patches(x, kh, kw, stride, conv["pad"], 0.0)
        ho, wo = patches.shape[1], patches.shape[2]
        k_real = kh * kw * c
        a = patches.reshape(n * ho * wo, k_real)

    kpad = conv["wmat"].shape[0]          # weight already stored at bucketed K
    if kpad > k_real:
        a = jnp.pad(a, ((0, 0), (0, kpad - k_real)))

    pro = (pro_bn["scale"], pro_bn["shift"]) if pro_bn is not None else None
    epi = (epi_bn["scale"], epi_bn["shift"]) if epi_bn is not None else None
    out = _pallas_conv_mm(a, conv["wmat"], pro, epi)
    if out.shape[1] != conv["cout"]:
        out = out[:, :conv["cout"]]       # crop lane-padded output channels
    return out.reshape(n, ho, wo, conv["cout"])


def maxpool_3x3_s2_p1(x):
    patches = _extract_patches(x, 3, 3, 2, 1, -jnp.inf)
    n, ho, wo, kk, c = patches.shape
    out = _pallas_window_reduce(patches.reshape(n * ho * wo, kk, c), op="max")
    return out.reshape(n, ho, wo, c)


def avgpool_2x2_s2(x):
    patches = _extract_patches(x, 2, 2, 2, 0, 0.0)
    n, ho, wo, kk, c = patches.shape
    out = _pallas_window_reduce(patches.reshape(n * ho * wo, kk, c), op="mean")
    return out.reshape(n, ho, wo, c)


# ----------------------------------------------------------------------------
# Deterministic synthetic parameter initialization (numpy: no device compiles)
# ----------------------------------------------------------------------------
def _init_conv(rng, cin, cout, kh, kw, stride, pad, kpad=None, npad=None):
    """He-init conv weight stored in (kpad, npad) matmul form, zero padded, bf16."""
    fan_in = cin * kh * kw
    kpad = fan_in if kpad is None else kpad
    npad = cout if npad is None else npad
    w = np.zeros((kpad, npad), np.float32)
    w[:fan_in, :cout] = (rng.standard_normal((fan_in, cout)).astype(np.float32)
                         * math.sqrt(2.0 / fan_in))
    return {"wmat": jnp.asarray(w, jnp.bfloat16), "cout": cout,
            "kh": kh, "kw": kw, "stride": stride, "pad": pad}


def _init_bn(rng, c, width=None):
    """Fold inference BN (gamma,beta,mean,var,eps) into scale/shift, zero-padded
    to `width` lanes so it rides inside a fused matmul prologue/epilogue."""
    width = c if width is None else width
    gamma = 1.0 + 0.05 * rng.standard_normal(c).astype(np.float32)
    beta = 0.05 * rng.standard_normal(c).astype(np.float32)
    mean = 0.05 * rng.standard_normal(c).astype(np.float32)
    var = 1.0 + 0.05 * rng.random(c).astype(np.float32)
    scale = np.zeros((1, width), np.float32)
    shift = np.zeros((1, width), np.float32)
    scale[0, :c] = gamma / np.sqrt(var + BN_EPS)
    shift[0, :c] = beta - mean * scale[0, :c]
    return {"scale": jnp.asarray(scale), "shift": jnp.asarray(shift)}


def init_densenet169_params(seed, class_count):
    rng = np.random.default_rng(seed)
    bottleneck = BN_SIZE * GROWTH_RATE                               # 128
    params = {
        # stem conv 7x7/2: K = 3*49 = 147 padded to 256, N = 64 padded to 128
        "conv0": _init_conv(rng, 3, NUM_INIT_FEATURES, 7, 7, 2, 3,
                            kpad=_round_up(3 * 7 * 7, 128), npad=128),
        "norm0": _init_bn(rng, NUM_INIT_FEATURES, width=128),        # conv0 epilogue
        "blocks": [],
        "transitions": [],
    }
    c = NUM_INIT_FEATURES
    for bi, num_layers in enumerate(BLOCK_CONFIG):
        layers = []
        for _ in range(num_layers):
            kpad = _round_up(c, K_BUCKET)
            layers.append({
                "norm1": _init_bn(rng, c, width=kpad),               # conv1 prologue
                "conv1": _init_conv(rng, c, bottleneck, 1, 1, 1, 0, kpad=kpad),
                "norm2": _init_bn(rng, bottleneck),                  # conv1 epilogue
                "conv2": _init_conv(rng, bottleneck, GROWTH_RATE, 3, 3, 1, 1,
                                    npad=128),
            })
            c += GROWTH_RATE
        params["blocks"].append(layers)
        if bi != len(BLOCK_CONFIG) - 1:
            params["transitions"].append({
                "norm": _init_bn(rng, c),                            # trans-conv prologue
                "conv": _init_conv(rng, c, c // 2, 1, 1, 1, 0),
            })
            c //= 2
    assert c == 1664, "densenet169 classifier.in_features must be 1664"
    params["norm5"] = _init_bn(rng, c)
    params["fc_w"] = jnp.asarray(
        rng.standard_normal((c, class_count)).astype(np.float32) / math.sqrt(c))
    params["fc_b"] = jnp.asarray(
        0.01 * rng.standard_normal((1, class_count)).astype(np.float32))
    return params


# ----------------------------------------------------------------------------
# DenseNet169 forward
# ----------------------------------------------------------------------------
def densenet169_forward(x_nchw, params):
    """x_nchw: (N, 3, H, W) float32 (PyTorch layout) -> sigmoid probs (N, classes)."""
    x = jnp.transpose(x_nchw, (0, 2, 3, 1)).astype(jnp.bfloat16)    # NCHW -> NHWC

    # Stem: conv7x7/2 with fused norm0+ReLU epilogue, then maxpool3x3/2.
    x = conv2d(x, params["conv0"], epi_bn=params["norm0"])
    x = maxpool_3x3_s2_p1(x)

    # Dense blocks (6, 12, 32, 32) with transitions.
    for bi, layers in enumerate(params["blocks"]):
        for lp in layers:
            # norm1+ReLU fused into conv1's A prologue, norm2+ReLU into its epilogue.
            out = conv2d(x, lp["conv1"], pro_bn=lp["norm1"], epi_bn=lp["norm2"])
            out = conv2d(out, lp["conv2"])                  # 3x3 growth conv (32 ch)
            # TODO(synk): concat re-copies the growing slab each layer; a
            # preallocated per-block channel slab with aliased writes would avoid it.
            x = jnp.concatenate([x, out], axis=-1)
        if bi != len(params["blocks"]) - 1:
            tp = params["transitions"][bi]
            x = conv2d(x, tp["conv"], pro_bn=tp["norm"])    # norm+ReLU fused prologue
            x = avgpool_2x2_s2(x)

    # norm5 + ReLU + global avg pool + Linear + Sigmoid in one fused head kernel.
    n, h, w, c = x.shape
    return _pallas_head(x.reshape(n, h * w, c),
                        params["norm5"]["scale"], params["norm5"]["shift"],
                        params["fc_w"], params["fc_b"])


if __name__ == "__main__":
    class_count = 14
    params = init_densenet169_params(0, class_count)
    x = jax.random.normal(jax.random.PRNGKey(0), (2, 3, 32, 32), jnp.float32)
    y = densenet169_forward(x, params)
    y = jax.block_until_ready(y)
    assert y.shape == (2, class_count), y.shape
    assert bool(jnp.all(jnp.isfinite(y)))
    assert bool(jnp.all((y >= 0.0) & (y <= 1.0)))   # sigmoid output
    print("KERNEL_OK")
</pallas_src>

<mosaic_0001>
module attributes {stable_mosaic.version = 11 : i64} {
  func.func @kernel(%arg0: memref<512x256xbf16, #tpu.memory_space<vmem>>, %arg1: memref<256x128xbf16, #tpu.memory_space<vmem>>, %arg2: memref<1x128xf32, #tpu.memory_space<vmem>>, %arg3: memref<1x128xf32, #tpu.memory_space<vmem>>, %arg4: memref<512x128xbf16, #tpu.memory_space<vmem>>) attributes {dimension_semantics = [], scalar_prefetch = 0 : i64, scratch_operands = 0 : i64, tpu.core_type = #tpu.core_type<tc>} {
    %c0 = arith.constant 0 : index
    %c0_0 = arith.constant 0 : index
    %0 = vector.load %arg0[%c0, %c0_0] : memref<512x256xbf16, #tpu.memory_space<vmem>>, vector<512x256xbf16>
    %c0_1 = arith.constant 0 : index
    %c0_2 = arith.constant 0 : index
    %1 = vector.load %arg1[%c0_1, %c0_2] : memref<256x128xbf16, #tpu.memory_space<vmem>>, vector<256x128xbf16>
    %cst = arith.constant dense<0.000000e+00> : vector<512x128xf32>
    %2 = tpu.matmul %0, %1, %cst {dimension_numbers = #tpu.dot_dimension_numbers<[1], [0], [0], [1], [0, 0, 1, 1], [], []>} : vector<512x256xbf16>, vector<256x128xbf16>, vector<512x128xf32> -> vector<512x128xf32>
    %c0_3 = arith.constant 0 : index
    %c0_4 = arith.constant 0 : index
    %3 = vector.load %arg2[%c0_3, %c0_4] : memref<1x128xf32, #tpu.memory_space<vmem>>, vector<1x128xf32>
    %c0_5 = arith.constant 0 : index
    %c0_6 = arith.constant 0 : index
    %4 = vector.load %arg3[%c0_5, %c0_6] : memref<1x128xf32, #tpu.memory_space<vmem>>, vector<1x128xf32>
    %5 = vector.broadcast %3 : vector<1x128xf32> to vector<512x128xf32>
    %6 = arith.mulf %2, %5 : vector<512x128xf32>
    %7 = vector.broadcast %4 : vector<1x128xf32> to vector<512x128xf32>
    %8 = arith.addf %6, %7 : vector<512x128xf32>
    %cst_7 = arith.constant 0.000000e+00 : f32
    %9 = vector.broadcast %cst_7 : f32 to vector<512x128xf32>
    %10 = arith.maximumf %8, %9 : vector<512x128xf32>
    %11 = arith.truncf %10 : vector<512x128xf32> to vector<512x128xbf16>
    %c0_8 = arith.constant 0 : index
    %c0_9 = arith.constant 0 : index
    %12 = vector.load %arg4[%c0_8, %c0_9] : memref<512x128xbf16, #tpu.memory_space<vmem>>, vector<512x128xbf16>
    tpu.vector_store %arg4[%c0_8, %c0_9], %11 {strides = array<i32>} : memref<512x128xbf16, #tpu.memory_space<vmem>>, vector<512x128xbf16>,
    return
  }
}

</mosaic_0001>

<bundles_post_ra>
// kernel: _pallas_conv_mm.1
= control target key start
LH: loop header
LB: loop body
LE: loop exit
PB: predicated region body
PF: predicated region fallthrough
CT: control target
= control target key end

     0   :  { %9 = vsyncpa [#allocation3], 0  ;;  %s2121_s0 = inlined_call_operand.hbm [shape: bf16[512,256], index: 0, kind: input, shape index: {}]   ;;  %s2122_s1 = inlined_call_operand.hbm [shape: bf16[256,128], index: 1, kind: input, shape index: {}]   ;;  %s2123_s2 = inlined_call_operand.vmem [shape: f32[1,128], index: 2, kind: input, shape index: {}]   ;;  %s2124_s3 = inlined_call_operand.vmem [shape: f32[1,128], index: 3, kind: input, shape index: {}]   ;;  %s2125_s4 = inlined_call_operand.hbm [shape: bf16[512,128], index: 4, kind: output, shape index: {}]  }
   0x1   :  { %10 = vsyncpa [#allocation6], 0 }
   0x2   :  { %11 = vsyncpa [#allocation4], 0  ;;  %s16_s17 = sshll.u32 %s2121_s0, 4  ;;  %s1944_s18 = smov [#allocation2]   ;;  %s17_s17 = int_to_ptr.hbm [resolvable:$true] %s16_s17 }
   0x3   :  { %s18_s19 = sshll.u32 %s1944_s18, 4  ;;  %s29_s22 = sshll.u32 %s2122_s1, 4  ;;  %s19_s19 = int_to_ptr.vmem [resolvable:$true] %s18_s19  ;;  %s30_s22 = int_to_ptr.hbm [resolvable:$true] %s29_s22 }
   0x4   :  { %s1945_s23 = smov 128   ;;  %s1946_s24 = smov 8  }
   0x5   :  { %24 = dma.hbm_to_vmem [thread:$0]  %s17_s17, 8192, %s19_s19, [#allocation3], %s1945_s23, %s1945_s23, %s1946_s24  }
   0x6   :  { %s1947_s25 = smov [#allocation5]   ;;  %s1948_s27 = smov 64  }
   0x7   :  { %s31_s26 = sshll.u32 %s1947_s25, 4  ;;  %s1949_s28 = smov 4   ;;  %s32_s26 = int_to_ptr.vmem [resolvable:$true] %s31_s26 }
   0x8   :  { %37 = dma.hbm_to_vmem [thread:$0]  %s30_s22, 2048, %s32_s26, [#allocation6], %s1948_s27, %s1948_s27, %s1949_s28  }
   0x9   :  { %1938 = dma.done.wait [#allocation3], 8192  }
   0xa   :  { %1939 = vsyncadd [#allocation3], 4294959104 }
   0xb   :  { %1940 = dma.done.wait [#allocation6], 2048  }
   0xc   :  { %1941 = vsyncadd [#allocation6], 4294965248  ;;  %v1639_v0 = vld [vmem:[#allocation5 + $0x38] sm:$0xff]  ;;  %v1638_v2 = vld [vmem:[#allocation5 + $0x30] sm:$0xff]  ;;  %s1234_s11 = sshll.u32 %s2125_s4, 4  ;;  %s1235_s11 = int_to_ptr.hbm [resolvable:$true] %s1234_s11 }
   0xd   :  { %v1647_v1 = vld [vmem:[#allocation5 + $0x78] sm:$0xff]  ;;  %562 = vmatpush.bf16.msra.mxu0 %v1639_v0  ;;  %1839 = vmatpush.bf16.msra.mxu2 %v1639_v0  ;;  %v1646_v3 = vld [vmem:[#allocation5 + $0x70] sm:$0xff]  ;;  %v1637_v4 = vld [vmem:[#allocation5 + $0x28] sm:$0xff] }
   0xe   :  { %731 = vmatpush.bf16.msra.mxu1 %v1647_v1  ;;  %1847 = vmatpush.bf16.msra.mxu3 %v1647_v1  ;;  %v1645_v5 = vld [vmem:[#allocation5 + $0x68] sm:$0xff]  ;;  %v1636_v6 = vld [vmem:[#allocation5 + $0x20] sm:$0xff]  ;;  %v1635_v8 = vld [vmem:[#allocation5 + $0x18] sm:$0xff] }
   0xf   :  { %v1644_v7 = vld [vmem:[#allocation5 + $0x60] sm:$0xff]  ;;  %v1643_v9 = vld [vmem:[#allocation5 + $0x58] sm:$0xff]  ;;  %v1634_v10 = vld [vmem:[#allocation5 + $0x10] sm:$0xff] }
  0x10   :  { %v1642_v11 = vld [vmem:[#allocation5 + $0x50] sm:$0xff]  ;;  %v1633_v12 = vld [vmem:[#allocation5 + $0x8] sm:$0xff]  ;;  %v1632_v14 = vld [vmem:[#allocation5] sm:$0xff] }
  0x11   :  { %563 = vmatpush.bf16.msra.mxu0 %v1638_v2  ;;  %1840 = vmatpush.bf16.msra.mxu2 %v1638_v2  ;;  %v1641_v13 = vld [vmem:[#allocation5 + $0x48] sm:$0xff]  ;;  %v1640_v15 = vld [vmem:[#allocation5 + $0x40] sm:$0xff]  ;;  %v1258_v28 = vld [vmem:[#allocation2 + $0x10] sm:$0xf] }
  0x12   :  { %732 = vmatpush.bf16.msra.mxu1 %v1646_v3  ;;  %1848 = vmatpush.bf16.msra.mxu3 %v1646_v3  ;;  %v1250_v16 = vld [vmem:[#allocation2] sm:$0xf]  ;;  %v1569_v17 = vld [vmem:[#allocation2 + $0x4] sm:$0xf0]  ;;  %v1568_v20 = vld [vmem:[#allocation2 + $0x4] sm:$0xf] }
  0x13   :  { %v1378_v18 = vld [vmem:[#allocation2 + $0x100] sm:$0xf]  ;;  %v1601_v19 = vld [vmem:[#allocation2 + $0x104] sm:$0xf0]  ;;  %v1252_v21 = vld [vmem:[#allocation2 + $0x8] sm:$0xf0]  ;;  %v1251_v24 = vor.u32 %v1569_v17, %v1250_v16 }
  0x14   :  { %v1600_v22 = vld [vmem:[#allocation2 + $0x104] sm:$0xf]  ;;  %v1380_v23 = vld [vmem:[#allocation2 + $0x108] sm:$0xf0]  ;;  %v1379_v25 = vor.u32 %v1601_v19, %v1378_v18  ;;  %v1255_v26 = vor.u32 %v1568_v20, %v1252_v21  ;;  %v1571_v29 = vld [vmem:[#allocation2 + $0x14] sm:$0xf0] }
  0x15   :  { %564 = vmatpush.bf16.msra.mxu0 %v1637_v4  ;;  %1841 = vmatpush.bf16.msra.mxu2 %v1637_v4  ;;  %v1383_v27 = vor.u32 %v1600_v22, %v1380_v23  ;;  %v1386_v30 = vld [vmem:[#allocation2 + $0x110] sm:$0xf]  ;;  %v1603_v31 = vld [vmem:[#allocation2 + $0x114] sm:$0xf0]  ;;  %v1570_v32 = vld [vmem:[#allocation2 + $0x14] sm:$0xf]  ;;  %v1259_v36 = vor.u32 %v1571_v29, %v1258_v28 }
  0x16   :  { %733 = vmatpush.bf16.msra.mxu1 %v1645_v5  ;;  %1849 = vmatpush.bf16.msra.mxu3 %v1645_v5  ;;  %v1260_v33 = vld [vmem:[#allocation2 + $0x18] sm:$0xf0]  ;;  %v1602_v34 = vld [vmem:[#allocation2 + $0x114] sm:$0xf]  ;;  %v1387_v37 = vor.u32 %v1603_v31, %v1386_v30  ;;  %v1266_v40 = vld [vmem:[#allocation2 + $0x20] sm:$0xf] }
  0x17   :  { %v1388_v35 = vld [vmem:[#allocation2 + $0x118] sm:$0xf0]  ;;  %v1263_v38 = vor.u32 %v1570_v32, %v1260_v33  ;;  %v1573_v41 = vld [vmem:[#allocation2 + $0x24] sm:$0xf0]  ;;  %v1394_v42 = vld [vmem:[#allocation2 + $0x120] sm:$0xf] }
  0x18   :  { %v1391_v39 = vor.u32 %v1602_v34, %v1388_v35  ;;  %v1605_v43 = vld [vmem:[#allocation2 + $0x124] sm:$0xf0]  ;;  %v1572_v44 = vld [vmem:[#allocation2 + $0x24] sm:$0xf]  ;;  %v1268_v45 = vld [vmem:[#allocation2 + $0x28] sm:$0xf0]  ;;  %v1267_v48 = vor.u32 %v1573_v41, %v1266_v40 }
  0x19   :  { %565 = vmatpush.bf16.msra.mxu0 %v1636_v6  ;;  %1842 = vmatpush.bf16.msra.mxu2 %v1636_v6  ;;  %v1604_v46 = vld [vmem:[#allocation2 + $0x124] sm:$0xf]  ;;  %v1396_v47 = vld [vmem:[#allocation2 + $0x128] sm:$0xf0]  ;;  %v1395_v49 = vor.u32 %v1605_v43, %v1394_v42  ;;  %v1271_v50 = vor.u32 %v1572_v44, %v1268_v45  ;;  %v1274_v52 = vld [vmem:[#allocation2 + $0x30] sm:$0xf] }
  0x1a   :  { %734 = vmatpush.bf16.msra.mxu1 %v1644_v7  ;;  %1850 = vmatpush.bf16.msra.mxu3 %v1644_v7  ;;  %v1399_v51 = vor.u32 %v1604_v46, %v1396_v47  ;;  %v1575_v53 = vld [vmem:[#allocation2 + $0x34] sm:$0xf0]  ;;  %v1402_v54 = vld [vmem:[#allocation2 + $0x130] sm:$0xf]  ;;  %v1574_v56 = vld [vmem:[#allocation2 + $0x34] sm:$0xf] }
  0x1b   :  { %v1607_v55 = vld [vmem:[#allocation2 + $0x134] sm:$0xf0]  ;;  %v1276_v57 = vld [vmem:[#allocation2 + $0x38] sm:$0xf0]  ;;  %v1606_v58 = vld [vmem:[#allocation2 + $0x134] sm:$0xf]  ;;  %v1275_v60 = vor.u32 %v1575_v53, %v1274_v52 }
  0x1c   :  { %v1404_v59 = vld [vmem:[#allocation2 + $0x138] sm:$0xf0]  ;;  %v1403_v61 = vor.u32 %v1607_v55, %v1402_v54  ;;  %v1279_v62 = vor.u32 %v1574_v56, %v1276_v57  ;;  %v1282_v0 = vld [vmem:[#allocation2 + $0x40] sm:$0xf]  ;;  %v1577_v1 = vld [vmem:[#allocation2 + $0x44] sm:$0xf0] }
  0x1d   :  { %566 = vmatpush.bf16.msra.mxu0 %v1635_v8  ;;  %1843 = vmatpush.bf16.msra.mxu2 %v1635_v8  ;;  %v1407_v63 = vor.u32 %v1606_v58, %v1404_v59  ;;  %v1410_v2 = vld [vmem:[#allocation2 + $0x140] sm:$0xf]  ;;  %v1609_v3 = vld [vmem:[#allocation2 + $0x144] sm:$0xf0]  ;;  %v1576_v4 = vld [vmem:[#allocation2 + $0x44] sm:$0xf]  ;;  %v1283_v8 = vor.u32 %v1577_v1, %v1282_v0 }
  0x1e   :  { %735 = vmatpush.bf16.msra.mxu1 %v1643_v9  ;;  %1851 = vmatpush.bf16.msra.mxu3 %v1643_v9  ;;  %v1284_v5 = vld [vmem:[#allocation2 + $0x48] sm:$0xf0]  ;;  %v1608_v6 = vld [vmem:[#allocation2 + $0x144] sm:$0xf]  ;;  %v1411_v9 = vor.u32 %v1609_v3, %v1410_v2  ;;  %v1578_v16 = vld [vmem:[#allocation2 + $0x54] sm:$0xf] }
  0x1f   :  { %v1412_v7 = vld [vmem:[#allocation2 + $0x148] sm:$0xf0]  ;;  %v1292_v17 = vld [vmem:[#allocation2 + $0x58] sm:$0xf0]  ;;  %v1610_v18 = vld [vmem:[#allocation2 + $0x154] sm:$0xf] }
  0x20   :  { %v1420_v19 = vld [vmem:[#allocation2 + $0x158] sm:$0xf0]  ;;  %v1295_v22 = vor.u32 %v1578_v16, %v1292_v17  ;;  %v1580_v28 = vld [vmem:[#allocation2 + $0x64] sm:$0xf]  ;;  %v1300_v29 = vld [vmem:[#allocation2 + $0x68] sm:$0xf0] }
  0x21   :  { %567 = vmatpush.bf16.msra.mxu0 %v1634_v10  ;;  %1844 = vmatpush.bf16.msra.mxu2 %v1634_v10  ;;  %v1287_v10 = vor.u32 %v1576_v4, %v1284_v5  ;;  %v1423_v23 = vor.u32 %v1610_v18, %v1420_v19  ;;  %v1612_v30 = vld [vmem:[#allocation2 + $0x164] sm:$0xf]  ;;  %v1428_v31 = vld [vmem:[#allocation2 + $0x168] sm:$0xf0]  ;;  %v1303_v34 = vor.u32 %v1580_v28, %v1300_v29  ;;  %v1582_v40 = vld [vmem:[#allocation2 + $0x74] sm:$0xf] }
  0x22   :  { %736 = vmatpush.bf16.msra.mxu1 %v1642_v11  ;;  %1852 = vmatpush.bf16.msra.mxu3 %v1642_v11  ;;  %v1415_v11 = vor.u32 %v1608_v6, %v1412_v7  ;;  %v1431_v35 = vor.u32 %v1612_v30, %v1428_v31  ;;  %v1308_v41 = vld [vmem:[#allocation2 + $0x78] sm:$0xf0]  ;;  %v1614_v42 = vld [vmem:[#allocation2 + $0x174] sm:$0xf]  ;;  %v1584_v52 = vld [vmem:[#allocation2 + $0x84] sm:$0xf] }
  0x23   :  { %v1436_v43 = vld [vmem:[#allocation2 + $0x178] sm:$0xf0]  ;;  %v1311_v46 = vor.u32 %v1582_v40, %v1308_v41  ;;  %v1316_v53 = vld [vmem:[#allocation2 + $0x88] sm:$0xf0]  ;;  %v1616_v54 = vld [vmem:[#allocation2 + $0x184] sm:$0xf] }
  0x24   :  { %v1439_v47 = vor.u32 %v1614_v42, %v1436_v43  ;;  %v1444_v55 = vld [vmem:[#allocation2 + $0x188] sm:$0xf0]  ;;  %v1319_v59 = vor.u32 %v1584_v52, %v1316_v53  ;;  %v1994_v3 = vld [vmem:[%s2124_s3] ss:$0 sm:$0xff]  ;;  %v1618_v16 = vld [vmem:[#allocation2 + $0x194] sm:$0xf] }
  0x25   :  { %568 = vmatpush.bf16.msra.mxu0 %v1633_v12  ;;  %1845 = vmatpush.bf16.msra.mxu2 %v1633_v12  ;;  %v1290_v12 = vld [vmem:[#allocation2 + $0x50] sm:$0xf]  ;;  %v1452_v17 = vld [vmem:[#allocation2 + $0x198] sm:$0xf0]  ;;  %v1588_v52 = vld [vmem:[#allocation2 + $0xa4] sm:$0xf] }
  0x26   :  { %737 = vmatpush.bf16.msra.mxu1 %v1641_v13  ;;  %1853 = vmatpush.bf16.msra.mxu3 %v1641_v13  ;;  %v1579_v13 = vld [vmem:[#allocation2 + $0x54] sm:$0xf0]  ;;  %v1455_v29 = vor.u32 %v1618_v16, %v1452_v17  ;;  %v1332_v53 = vld [vmem:[#allocation2 + $0xa8] sm:$0xf0] }
  0x27   :  { %v1291_v20 = vor.u32 %v1579_v13, %v1290_v12  ;;  %v1619_v13 = vld [vmem:[#allocation2 + $0x194] sm:$0xf0] }
  0x29   :  { %569 = vmatpush.bf16.msra.mxu0 %v1632_v14  ;;  %1846 = vmatpush.bf16.msra.mxu2 %v1632_v14  ;;  %v1418_v14 = vld [vmem:[#allocation2 + $0x150] sm:$0xf] }
  0x2a   :  { %738 = vmatpush.bf16.msra.mxu1 %v1640_v15  ;;  %1854 = vmatpush.bf16.msra.mxu3 %v1640_v15  ;;  %v1611_v15 = vld [vmem:[#allocation2 + $0x154] sm:$0xf0] }
  0x2b   :  { %v1419_v21 = vor.u32 %v1611_v15, %v1418_v14  ;;  %v1586_v14 = vld [vmem:[#allocation2 + $0x94] sm:$0xf]  ;;  %v1324_v15 = vld [vmem:[#allocation2 + $0x98] sm:$0xf0] }
  0x2c   :  { %570 = vmatmul.bf16.vlgmr.msra.gmra.mxu0 %v1251_v24  ;;  %650 = vmatmul.bf16.vlgmr.msra.gmra.mxu2 %v1379_v25  ;;  %v1298_v24 = vld [vmem:[#allocation2 + $0x60] sm:$0xf]  ;;  %v1581_v25 = vld [vmem:[#allocation2 + $0x64] sm:$0xf0] }
  0x2d   :  { %739 = vmatmul.bf16.vlgmr.msra.gmra.mxu1 %v1255_v26  ;;  %819 = vmatmul.bf16.vlgmr.msra.gmra.mxu3 %v1383_v27  ;;  %v1426_v26 = vld [vmem:[#allocation2 + $0x160] sm:$0xf]  ;;  %v1613_v27 = vld [vmem:[#allocation2 + $0x164] sm:$0xf0]  ;;  %v1299_v32 = vor.u32 %v1581_v25, %v1298_v24  ;;  %v1327_v24 = vor.u32 %v1586_v14, %v1324_v15 }
  0x2e   :  { %v1427_v33 = vor.u32 %v1613_v27, %v1426_v26 }
  0x3c   :  { %575 = vmatmul.bf16.gmra.mxu0 %v1259_v36  ;;  %655 = vmatmul.bf16.gmra.mxu2 %v1387_v37  ;;  %v1306_v36 = vld [vmem:[#allocation2 + $0x70] sm:$0xf]  ;;  %v1583_v37 = vld [vmem:[#allocation2 + $0x74] sm:$0xf0] }
  0x3d   :  { %744 = vmatmul.bf16.gmra.mxu1 %v1263_v38  ;;  %824 = vmatmul.bf16.gmra.mxu3 %v1391_v39  ;;  %v1434_v38 = vld [vmem:[#allocation2 + $0x170] sm:$0xf]  ;;  %v1615_v39 = vld [vmem:[#allocation2 + $0x174] sm:$0xf0]  ;;  %v1307_v44 = vor.u32 %v1583_v37, %v1306_v36 }
  0x3e   :  { %v1435_v45 = vor.u32 %v1615_v39, %v1434_v38 }
  0x4c   :  { %580 = vmatmul.bf16.gmra.mxu0 %v1267_v48  ;;  %660 = vmatmul.bf16.gmra.mxu2 %v1395_v49  ;;  %v1314_v48 = vld [vmem:[#allocation2 + $0x80] sm:$0xf]  ;;  %v1585_v49 = vld [vmem:[#allocation2 + $0x84] sm:$0xf0] }
  0x4d   :  { %749 = vmatmul.bf16.gmra.mxu1 %v1271_v50  ;;  %829 = vmatmul.bf16.gmra.mxu3 %v1399_v51  ;;  %v1442_v50 = vld [vmem:[#allocation2 + $0x180] sm:$0xf]  ;;  %v1617_v51 = vld [vmem:[#allocation2 + $0x184] sm:$0xf0]  ;;  %v1315_v56 = vor.u32 %v1585_v49, %v1314_v48 }
  0x4e   :  { %v1443_v57 = vor.u32 %v1617_v51, %v1442_v50  ;;  %v1458_v48 = vld [vmem:[#allocation2 + $0x1a0] sm:$0xf]  ;;  %v1621_v51 = vld [vmem:[#allocation2 + $0x1a4] sm:$0xf0] }
  0x5c   :  { %585 = vmatmul.bf16.gmra.mxu0 %v1275_v60  ;;  %665 = vmatmul.bf16.gmra.mxu2 %v1403_v61  ;;  %v1447_v60 = vor.u32 %v1616_v54, %v1444_v55  ;;  %v1620_v54 = vld [vmem:[#allocation2 + $0x1a4] sm:$0xf]  ;;  %v1460_v55 = vld [vmem:[#allocation2 + $0x1a8] sm:$0xf0] }
  0x5d   :  { %754 = vmatmul.bf16.gmra.mxu1 %v1279_v62  ;;  %834 = vmatmul.bf16.gmra.mxu3 %v1407_v63  ;;  %v1988_v63 = vld [vmem:[%s2123_s2] ss:$0 sm:$0xff] }
  0x6c   :  { %590 = vmatmul.bf16.gmra.mxu0 %v1283_v8  ;;  %670 = vmatmul.bf16.gmra.mxu2 %v1411_v9  ;;  %v1322_v8 = vld [vmem:[#allocation2 + $0x90] sm:$0xf]  ;;  %v1587_v9 = vld [vmem:[#allocation2 + $0x94] sm:$0xf0] }
  0x6d   :  { %759 = vmatmul.bf16.gmra.mxu1 %v1287_v10  ;;  %839 = vmatmul.bf16.gmra.mxu3 %v1415_v11  ;;  %v1450_v10 = vld [vmem:[#allocation2 + $0x190] sm:$0xf] }
  0x7c   :  { %595 = vmatmul.bf16.gmra.mxu0 %v1291_v20  ;;  %675 = vmatmul.bf16.gmra.mxu2 %v1419_v21 }
  0x7d   :  { %764 = vmatmul.bf16.gmra.mxu1 %v1295_v22  ;;  %844 = vmatmul.bf16.gmra.mxu3 %v1423_v23  ;;  %v1323_v22 = vor.u32 %v1587_v9, %v1322_v8  ;;  %v1451_v23 = vor.u32 %v1619_v13, %v1450_v10 }
  0x8c   :  { %600 = vmatmul.bf16.gmra.mxu0 %v1299_v32  ;;  %680 = vmatmul.bf16.gmra.mxu2 %v1427_v33 }
  0x8d   :  { %769 = vmatmul.bf16.gmra.mxu1 %v1303_v34  ;;  %849 = vmatmul.bf16.gmra.mxu3 %v1431_v35 }
  0x9c   :  { %605 = vmatmul.bf16.gmra.mxu0 %v1307_v44  ;;  %685 = vmatmul.bf16.gmra.mxu2 %v1435_v45 }
  0x9d   :  { %774 = vmatmul.bf16.gmra.mxu1 %v1311_v46  ;;  %854 = vmatmul.bf16.gmra.mxu3 %v1439_v47  ;;  %v1330_v46 = vld [vmem:[#allocation2 + $0xa0] sm:$0xf]  ;;  %v1589_v47 = vld [vmem:[#allocation2 + $0xa4] sm:$0xf0] }
  0xa9   :  { %v571_v58 = vpop.f32.mrf.mxu0 }
  0xaa   :  { %v740_v61 = vpop.f32.mrf.mxu1 }
  0xab   :  { %v741_v62 = vadd.f32 %v740_v61, %v571_v58  ;;  %v1459_v61 = vor.u32 %v1621_v51, %v1458_v48 }
  0xac   :  { %610 = vmatmul.bf16.gmra.mxu0 %v1315_v56  ;;  %690 = vmatmul.bf16.gmra.mxu2 %v1443_v57 }
  0xad   :  { %779 = vmatmul.bf16.gmra.mxu1 %v1319_v59  ;;  %859 = vmatmul.bf16.gmra.mxu3 %v1447_v60  ;;  %v905_v2 = vmul.f32 %v1988_v63, %v741_v62  ;;  %v1331_v60 = vor.u32 %v1589_v47, %v1330_v46  ;;  %v1335_v62 = vor.u32 %v1588_v52, %v1332_v53 }
  0xaf   :  { %v651_v0 = vpop.f32.mrf.mxu2  ;;  %v972_v11 = vadd.f32 %v1994_v3, %v905_v2 }
  0xb0   :  { %v820_v1 = vpop.f32.mrf.mxu3 }
  0xb1   :  { %v573_v4 = vpop.f32.mrf.mxu0  ;;  %v821_v6 = vadd.f32 %v820_v1, %v651_v0  ;;  %v1036_v25 = vmax.f32 %v972_v11, 0.0 }
  0xb2   :  { %v742_v5 = vpop.f32.mrf.mxu1 }
  0xb3   :  { %v743_v7 = vadd.f32 %v742_v5, %v573_v4  ;;  %v937_v18 = vmul.f32 %v1988_v63, %v821_v6  ;;  %v1463_v5 = vor.u32 %v1620_v54, %v1460_v55 }
  0xb5   :  { %v906_v12 = vmul.f32 %v1988_v63, %v743_v7  ;;  %v1004_v31 = vadd.f32 %v1994_v3, %v937_v18 }
  0xb7   :  { %v973_v19 = vadd.f32 %v1994_v3, %v906_v12  ;;  %v653_v20 = vpop.f32.mrf.mxu2  ;;  %v1068_v36 = vmax.f32 %v1004_v31, 0.0  ;;  %v1468_v31 = vld [vmem:[#allocation2 + $0x1b8] sm:$0xf0] }
  0xb8   :  { %v822_v21 = vpop.f32.mrf.mxu3 }
  0xb9   :  { %v1037_v26 = vmax.f32 %v973_v19, 0.0  ;;  %v823_v27 = vadd.f32 %v822_v21, %v653_v20  ;;  %v576_v28 = vpop.f32.mrf.mxu0 }
  0xba   :  { %v745_v30 = vpop.f32.mrf.mxu1 }
  0xbb   :  { %v1651_v32 = vpack.c.bf16 %v1037_v26, %v1036_v25  ;;  %v938_v33 = vmul.f32 %v1988_v63, %v823_v27  ;;  %v746_v35 = vadd.f32 %v745_v30, %v576_v28  ;;  %v1623_v27 = vld [vmem:[#allocation2 + $0x1b4] sm:$0xf0]  ;;  %v1590_v28 = vld [vmem:[#allocation2 + $0xb4] sm:$0xf] }
  0xbc   :  { %615 = vmatmul.bf16.gmra.mxu0 %v1323_v22  ;;  %695 = vmatmul.bf16.gmra.mxu2 %v1451_v23  ;;  %v1338_v22 = vld [vmem:[#allocation2 + $0xb0] sm:$0xf]  ;;  %v1591_v23 = vld [vmem:[#allocation2 + $0xb4] sm:$0xf0]  ;;  %v1622_v30 = vld [vmem:[#allocation2 + $0x1b4] sm:$0xf] }
  0xbd   :  { %1652 = vst [vmem:[#allocation7] sm:$0xff] %v1651_v32   ;;  %v1005_v34 = vadd.f32 %v1994_v3, %v938_v33  ;;  %784 = vmatmul.bf16.gmra.mxu1 %v1327_v24  ;;  %864 = vmatmul.bf16.gmra.mxu3 %v1455_v29  ;;  %v907_v41 = vmul.f32 %v1988_v63, %v746_v35  ;;  %v1466_v24 = vld [vmem:[#allocation2 + $0x1b0] sm:$0xf]  ;;  %v1340_v29 = vld [vmem:[#allocation2 + $0xb8] sm:$0xf0] }
  0xbf   :  { %v1069_v37 = vmax.f32 %v1005_v34, 0.0  ;;  %v656_v38 = vpop.f32.mrf.mxu2  ;;  %v974_v49 = vadd.f32 %v1994_v3, %v907_v41 }
  0xc0   :  { %v825_v39 = vpop.f32.mrf.mxu3 }
  0xc1   :  { %v1731_v40 = vpack.c.bf16 %v1069_v37, %v1068_v36  ;;  %v578_v42 = vpop.f32.mrf.mxu0  ;;  %v826_v44 = vadd.f32 %v825_v39, %v656_v38  ;;  %v1038_v0 = vmax.f32 %v974_v49, 0.0  ;;  %v1339_v36 = vor.u32 %v1591_v23, %v1338_v22 }
  0xc2   :  { %v747_v43 = vpop.f32.mrf.mxu1  ;;  %v1467_v37 = vor.u32 %v1623_v27, %v1466_v24  ;;  %v1343_v38 = vor.u32 %v1590_v28, %v1340_v29 }
  0xc3   :  { %1823 = vst [vmem:[#allocation7 + $0x80] sm:$0xff] %v1731_v40   ;;  %v748_v45 = vadd.f32 %v747_v43, %v578_v42  ;;  %v939_v56 = vmul.f32 %v1988_v63, %v826_v44  ;;  %v1471_v43 = vor.u32 %v1622_v30, %v1468_v31 }
  0xc5   :  { %v908_v50 = vmul.f32 %v1988_v63, %v748_v45  ;;  %v1006_v7 = vadd.f32 %v1994_v3, %v939_v56 }
  0xc7   :  { %v975_v57 = vadd.f32 %v1994_v3, %v908_v50  ;;  %v658_v58 = vpop.f32.mrf.mxu2  ;;  %v1070_v12 = vmax.f32 %v1006_v7, 0.0  ;;  %v1476_v7 = vld [vmem:[#allocation2 + $0x1c8] sm:$0xf0] }
  0xc8   :  { %v827_v59 = vpop.f32.mrf.mxu3 }
  0xc9   :  { %v1039_v1 = vmax.f32 %v975_v57, 0.0  ;;  %v828_v2 = vadd.f32 %v827_v59, %v658_v58  ;;  %v581_v4 = vpop.f32.mrf.mxu0 }
  0xca   :  { %v750_v6 = vpop.f32.mrf.mxu1 }
  0xcb   :  { %v1656_v8 = vpack.c.bf16 %v1039_v1, %v1038_v0  ;;  %v940_v9 = vmul.f32 %v1988_v63, %v828_v2  ;;  %v751_v11 = vadd.f32 %v750_v6, %v581_v4  ;;  %v1625_v2 = vld [vmem:[#allocation2 + $0x1c4] sm:$0xf0]  ;;  %v1592_v4 = vld [vmem:[#allocation2 + $0xc4] sm:$0xf] }
  0xcc   :  { %620 = vmatmul.bf16.gmra.mxu0 %v1331_v60  ;;  %700 = vmatmul.bf16.gmra.mxu2 %v1459_v61  ;;  %v1346_v60 = vld [vmem:[#allocation2 + $0xc0] sm:$0xf]  ;;  %v1593_v61 = vld [vmem:[#allocation2 + $0xc4] sm:$0xf0]  ;;  %v1624_v6 = vld [vmem:[#allocation2 + $0x1c4] sm:$0xf] }
  0xcd   :  { %1808 = vst [vmem:[#allocation7 + $0x8] sm:$0xff] %v1656_v8   ;;  %v1007_v10 = vadd.f32 %v1994_v3, %v940_v9  ;;  %789 = vmatmul.bf16.gmra.mxu1 %v1335_v62  ;;  %869 = vmatmul.bf16.gmra.mxu3 %v1463_v5  ;;  %v909_v17 = vmul.f32 %v1988_v63, %v751_v11  ;;  %v1474_v62 = vld [vmem:[#allocation2 + $0x1c0] sm:$0xf]  ;;  %v1348_v5 = vld [vmem:[#allocation2 + $0xc8] sm:$0xf0] }
  0xcf   :  { %v1071_v13 = vmax.f32 %v1007_v10, 0.0  ;;  %v661_v14 = vpop.f32.mrf.mxu2  ;;  %v976_v25 = vadd.f32 %v1994_v3, %v909_v17 }
  0xd0   :  { %v830_v15 = vpop.f32.mrf.mxu3 }
  0xd1   :  { %v1736_v16 = vpack.c.bf16 %v1071_v13, %v1070_v12  ;;  %v583_v18 = vpop.f32.mrf.mxu0  ;;  %v831_v20 = vadd.f32 %v830_v15, %v661_v14  ;;  %v1040_v39 = vmax.f32 %v976_v25, 0.0  ;;  %v1347_v12 = vor.u32 %v1593_v61, %v1346_v60 }
  0xd2   :  { %v752_v19 = vpop.f32.mrf.mxu1  ;;  %v1475_v13 = vor.u32 %v1625_v2, %v1474_v62  ;;  %v1351_v14 = vor.u32 %v1592_v4, %v1348_v5 }
  0xd3   :  { %1824 = vst [vmem:[#allocation7 + $0x88] sm:$0xff] %v1736_v16   ;;  %v753_v21 = vadd.f32 %v752_v19, %v583_v18  ;;  %v941_v32 = vmul.f32 %v1988_v63, %v831_v20  ;;  %v1479_v19 = vor.u32 %v1624_v6, %v1476_v7 }
  0xd5   :  { %v910_v26 = vmul.f32 %v1988_v63, %v753_v21  ;;  %v1008_v45 = vadd.f32 %v1994_v3, %v941_v32 }
  0xd7   :  { %v977_v33 = vadd.f32 %v1994_v3, %v910_v26  ;;  %v663_v34 = vpop.f32.mrf.mxu2  ;;  %v1072_v50 = vmax.f32 %v1008_v45, 0.0  ;;  %v1484_v45 = vld [vmem:[#allocation2 + $0x1d8] sm:$0xf0] }
  0xd8   :  { %v832_v35 = vpop.f32.mrf.mxu3 }
  0xd9   :  { %v1041_v40 = vmax.f32 %v977_v33, 0.0  ;;  %v833_v41 = vadd.f32 %v832_v35, %v663_v34  ;;  %v586_v42 = vpop.f32.mrf.mxu0 }
  0xda   :  { %v755_v44 = vpop.f32.mrf.mxu1 }
  0xdb   :  { %v1661_v46 = vpack.c.bf16 %v1041_v40, %v1040_v39  ;;  %v942_v47 = vmul.f32 %v1988_v63, %v833_v41  ;;  %v756_v49 = vadd.f32 %v755_v44, %v586_v42  ;;  %v1627_v41 = vld [vmem:[#allocation2 + $0x1d4] sm:$0xf0]  ;;  %v1594_v42 = vld [vmem:[#allocation2 + $0xd4] sm:$0xf] }
  0xdc   :  { %625 = vmatmul.bf16.gmra.mxu0 %v1339_v36  ;;  %705 = vmatmul.bf16.gmra.mxu2 %v1467_v37  ;;  %v1354_v36 = vld [vmem:[#allocation2 + $0xd0] sm:$0xf]  ;;  %v1595_v37 = vld [vmem:[#allocation2 + $0xd4] sm:$0xf0]  ;;  %v1626_v44 = vld [vmem:[#allocation2 + $0x1d4] sm:$0xf] }
  0xdd   :  { %1809 = vst [vmem:[#allocation7 + $0x10] sm:$0xff] %v1661_v46   ;;  %v1009_v48 = vadd.f32 %v1994_v3, %v942_v47  ;;  %794 = vmatmul.bf16.gmra.mxu1 %v1343_v38  ;;  %874 = vmatmul.bf16.gmra.mxu3 %v1471_v43  ;;  %v911_v55 = vmul.f32 %v1988_v63, %v756_v49  ;;  %v1482_v38 = vld [vmem:[#allocation2 + $0x1d0] sm:$0xf]  ;;  %v1356_v43 = vld [vmem:[#allocation2 + $0xd8] sm:$0xf0] }
  0xdf   :  { %v1073_v51 = vmax.f32 %v1009_v48, 0.0  ;;  %v666_v52 = vpop.f32.mrf.mxu2  ;;  %v978_v0 = vadd.f32 %v1994_v3, %v911_v55 }
  0xe0   :  { %v835_v53 = vpop.f32.mrf.mxu3 }
  0xe1   :  { %v1741_v54 = vpack.c.bf16 %v1073_v51, %v1072_v50  ;;  %v588_v56 = vpop.f32.mrf.mxu0  ;;  %v836_v58 = vadd.f32 %v835_v53, %v666_v52  ;;  %v1042_v15 = vmax.f32 %v978_v0, 0.0  ;;  %v1355_v50 = vor.u32 %v1595_v37, %v1354_v36 }
  0xe2   :  { %v757_v57 = vpop.f32.mrf.mxu1  ;;  %v1483_v51 = vor.u32 %v1627_v41, %v1482_v38  ;;  %v1359_v52 = vor.u32 %v1594_v42, %v1356_v43 }
  0xe3   :  { %1825 = vst [vmem:[#allocation7 + $0x90] sm:$0xff] %v1741_v54   ;;  %v758_v59 = vadd.f32 %v757_v57, %v588_v56  ;;  %v943_v8 = vmul.f32 %v1988_v63, %v836_v58  ;;  %v1487_v57 = vor.u32 %v1626_v44, %v1484_v45 }
  0xe5   :  { %v912_v1 = vmul.f32 %v1988_v63, %v758_v59  ;;  %v1010_v21 = vadd.f32 %v1994_v3, %v943_v8 }
  0xe7   :  { %v979_v9 = vadd.f32 %v1994_v3, %v912_v1  ;;  %v668_v10 = vpop.f32.mrf.mxu2  ;;  %v1074_v26 = vmax.f32 %v1010_v21, 0.0  ;;  %v1492_v21 = vld [vmem:[#allocation2 + $0x1e8] sm:$0xf0] }
  0xe8   :  { %v837_v11 = vpop.f32.mrf.mxu3 }
  0xe9   :  { %v1043_v16 = vmax.f32 %v979_v9, 0.0  ;;  %v838_v17 = vadd.f32 %v837_v11, %v668_v10  ;;  %v591_v18 = vpop.f32.mrf.mxu0 }
  0xea   :  { %v760_v20 = vpop.f32.mrf.mxu1 }
  0xeb   :  { %v1666_v22 = vpack.c.bf16 %v1043_v16, %v1042_v15  ;;  %v944_v23 = vmul.f32 %v1988_v63, %v838_v17  ;;  %v761_v25 = vadd.f32 %v760_v20, %v591_v18  ;;  %v1629_v17 = vld [vmem:[#allocation2 + $0x1e4] sm:$0xf0]  ;;  %v1596_v18 = vld [vmem:[#allocation2 + $0xe4] sm:$0xf] }
  0xec   :  { %630 = vmatmul.bf16.gmra.mxu0 %v1347_v12  ;;  %710 = vmatmul.bf16.gmra.mxu2 %v1475_v13  ;;  %v1362_v12 = vld [vmem:[#allocation2 + $0xe0] sm:$0xf]  ;;  %v1597_v13 = vld [vmem:[#allocation2 + $0xe4] sm:$0xf0]  ;;  %v1628_v20 = vld [vmem:[#allocation2 + $0x1e4] sm:$0xf] }
  0xed   :  { %1810 = vst [vmem:[#allocation7 + $0x18] sm:$0xff] %v1666_v22   ;;  %v1011_v24 = vadd.f32 %v1994_v3, %v944_v23  ;;  %799 = vmatmul.bf16.gmra.mxu1 %v1351_v14  ;;  %879 = vmatmul.bf16.gmra.mxu3 %v1479_v19  ;;  %v913_v31 = vmul.f32 %v1988_v63, %v761_v25  ;;  %v1490_v14 = vld [vmem:[#allocation2 + $0x1e0] sm:$0xf]  ;;  %v1364_v19 = vld [vmem:[#allocation2 + $0xe8] sm:$0xf0] }
  0xef   :  { %v1075_v27 = vmax.f32 %v1011_v24, 0.0  ;;  %v671_v28 = vpop.f32.mrf.mxu2  ;;  %v980_v39 = vadd.f32 %v1994_v3, %v913_v31 }
  0xf0   :  { %v840_v29 = vpop.f32.mrf.mxu3 }
  0xf1   :  { %v1746_v30 = vpack.c.bf16 %v1075_v27, %v1074_v26  ;;  %v593_v32 = vpop.f32.mrf.mxu0  ;;  %v841_v34 = vadd.f32 %v840_v29, %v671_v28  ;;  %v1044_v53 = vmax.f32 %v980_v39, 0.0  ;;  %v1363_v26 = vor.u32 %v1597_v13, %v1362_v12 }
  0xf2   :  { %v762_v33 = vpop.f32.mrf.mxu1  ;;  %v1491_v27 = vor.u32 %v1629_v17, %v1490_v14  ;;  %v1367_v28 = vor.u32 %v1596_v18, %v1364_v19 }
  0xf3   :  { %1826 = vst [vmem:[#allocation7 + $0x98] sm:$0xff] %v1746_v30   ;;  %v763_v35 = vadd.f32 %v762_v33, %v593_v32  ;;  %v945_v46 = vmul.f32 %v1988_v63, %v841_v34  ;;  %v1495_v33 = vor.u32 %v1628_v20, %v1492_v21 }
  0xf5   :  { %v914_v40 = vmul.f32 %v1988_v63, %v763_v35  ;;  %v1012_v59 = vadd.f32 %v1994_v3, %v945_v46 }
  0xf7   :  { %v981_v47 = vadd.f32 %v1994_v3, %v914_v40  ;;  %v673_v48 = vpop.f32.mrf.mxu2  ;;  %v1076_v1 = vmax.f32 %v1012_v59, 0.0  ;;  %v1500_v59 = vld [vmem:[#allocation2 + $0x1f8] sm:$0xf0] }
  0xf8   :  { %v842_v49 = vpop.f32.mrf.mxu3 }
  0xf9   :  { %v1045_v54 = vmax.f32 %v981_v47, 0.0  ;;  %v843_v55 = vadd.f32 %v842_v49, %v673_v48  ;;  %v596_v56 = vpop.f32.mrf.mxu0 }
  0xfa   :  { %v765_v58 = vpop.f32.mrf.mxu1 }
  0xfb   :  { %v1671_v60 = vpack.c.bf16 %v1045_v54, %v1044_v53  ;;  %v946_v61 = vmul.f32 %v1988_v63, %v843_v55  ;;  %v766_v0 = vadd.f32 %v765_v58, %v596_v56  ;;  %v1631_v55 = vld [vmem:[#allocation2 + $0x1f4] sm:$0xf0]  ;;  %v1598_v56 = vld [vmem:[#allocation2 + $0xf4] sm:$0xf] }
  0xfc   :  { %635 = vmatmul.bf16.gmra.mxu0 %v1355_v50  ;;  %715 = vmatmul.bf16.gmra.mxu2 %v1483_v51  ;;  %v1370_v50 = vld [vmem:[#allocation2 + $0xf0] sm:$0xf]  ;;  %v1599_v51 = vld [vmem:[#allocation2 + $0xf4] sm:$0xf0]  ;;  %v1630_v58 = vld [vmem:[#allocation2 + $0x1f4] sm:$0xf] }
  0xfd   :  { %1811 = vst [vmem:[#allocation7 + $0x20] sm:$0xff] %v1671_v60   ;;  %v1013_v62 = vadd.f32 %v1994_v3, %v946_v61  ;;  %804 = vmatmul.bf16.gmra.mxu1 %v1359_v52  ;;  %884 = vmatmul.bf16.gmra.mxu3 %v1487_v57  ;;  %v915_v7 = vmul.f32 %v1988_v63, %v766_v0  ;;  %v1498_v52 = vld [vmem:[#allocation2 + $0x1f0] sm:$0xf]  ;;  %v1372_v57 = vld [vmem:[#allocation2 + $0xf8] sm:$0xf0] }
  0xff   :  { %v1077_v2 = vmax.f32 %v1013_v62, 0.0  ;;  %v676_v4 = vpop.f32.mrf.mxu2  ;;  %v982_v15 = vadd.f32 %v1994_v3, %v915_v7 }
 0x100   :  { %v845_v5 = vpop.f32.mrf.mxu3 }
 0x101   :  { %v1751_v6 = vpack.c.bf16 %v1077_v2, %v1076_v1  ;;  %v598_v8 = vpop.f32.mrf.mxu0  ;;  %v846_v10 = vadd.f32 %v845_v5, %v676_v4  ;;  %v1046_v29 = vmax.f32 %v982_v15, 0.0  ;;  %v1371_v1 = vor.u32 %v1599_v51, %v1370_v50 }
 0x102   :  { %v767_v9 = vpop.f32.mrf.mxu1  ;;  %v1499_v2 = vor.u32 %v1631_v55, %v1498_v52  ;;  %v1375_v4 = vor.u32 %v1598_v56, %v1372_v57 }
 0x103   :  { %1827 = vst [vmem:[#allocation7 + $0xa0] sm:$0xff] %v1751_v6   ;;  %v768_v11 = vadd.f32 %v767_v9, %v598_v8  ;;  %v947_v22 = vmul.f32 %v1988_v63, %v846_v10  ;;  %v1503_v9 = vor.u32 %v1630_v58, %v1500_v59 }
 0x105   :  { %v916_v16 = vmul.f32 %v1988_v63, %v768_v11  ;;  %v1014_v35 = vadd.f32 %v1994_v3, %v947_v22 }
 0x107   :  { %v983_v23 = vadd.f32 %v1994_v3, %v916_v16  ;;  %v678_v24 = vpop.f32.mrf.mxu2  ;;  %v1078_v40 = vmax.f32 %v1014_v35, 0.0 }
 0x108   :  { %v847_v25 = vpop.f32.mrf.mxu3 }
 0x109   :  { %v1047_v30 = vmax.f32 %v983_v23, 0.0  ;;  %v848_v31 = vadd.f32 %v847_v25, %v678_v24  ;;  %v601_v32 = vpop.f32.mrf.mxu0 }
 0x10a   :  { %v770_v34 = vpop.f32.mrf.mxu1 }
 0x10b   :  { %v1676_v36 = vpack.c.bf16 %v1047_v30, %v1046_v29  ;;  %v948_v37 = vmul.f32 %v1988_v63, %v848_v31  ;;  %v771_v39 = vadd.f32 %v770_v34, %v601_v32 }
 0x10c   :  { %640 = vmatmul.bf16.gmra.mxu0 %v1363_v26  ;;  %720 = vmatmul.bf16.gmra.mxu2 %v1491_v27 }
 0x10d   :  { %1812 = vst [vmem:[#allocation7 + $0x28] sm:$0xff] %v1676_v36   ;;  %v1015_v38 = vadd.f32 %v1994_v3, %v948_v37  ;;  %809 = vmatmul.bf16.gmra.mxu1 %v1367_v28  ;;  %889 = vmatmul.bf16.gmra.mxu3 %v1495_v33  ;;  %v917_v45 = vmul.f32 %v1988_v63, %v771_v39 }
 0x10f   :  { %v1079_v41 = vmax.f32 %v1015_v38, 0.0  ;;  %v681_v42 = vpop.f32.mrf.mxu2  ;;  %v984_v53 = vadd.f32 %v1994_v3, %v917_v45 }
 0x110   :  { %v850_v43 = vpop.f32.mrf.mxu3 }
 0x111   :  { %v1756_v44 = vpack.c.bf16 %v1079_v41, %v1078_v40  ;;  %v603_v46 = vpop.f32.mrf.mxu0  ;;  %v851_v48 = vadd.f32 %v850_v43, %v681_v42  ;;  %v1048_v5 = vmax.f32 %v984_v53, 0.0 }
 0x112   :  { %v772_v47 = vpop.f32.mrf.mxu1 }
 0x113   :  { %1828 = vst [vmem:[#allocation7 + $0xa8] sm:$0xff] %v1756_v44   ;;  %v773_v49 = vadd.f32 %v772_v47, %v603_v46  ;;  %v949_v60 = vmul.f32 %v1988_v63, %v851_v48 }
 0x115   :  { %v918_v54 = vmul.f32 %v1988_v63, %v773_v49  ;;  %v1016_v11 = vadd.f32 %v1994_v3, %v949_v60 }
 0x117   :  { %v985_v61 = vadd.f32 %v1994_v3, %v918_v54  ;;  %v683_v62 = vpop.f32.mrf.mxu2  ;;  %v1080_v16 = vmax.f32 %v1016_v11, 0.0 }
 0x118   :  { %v852_v0 = vpop.f32.mrf.mxu3 }
 0x119   :  { %v1049_v6 = vmax.f32 %v985_v61, 0.0  ;;  %v853_v7 = vadd.f32 %v852_v0, %v683_v62  ;;  %v606_v8 = vpop.f32.mrf.mxu0 }
 0x11a   :  { %v775_v10 = vpop.f32.mrf.mxu1 }
 0x11b   :  { %v1681_v12 = vpack.c.bf16 %v1049_v6, %v1048_v5  ;;  %v950_v13 = vmul.f32 %v1988_v63, %v853_v7  ;;  %v776_v15 = vadd.f32 %v775_v10, %v606_v8 }
 0x11c   :  { %645 = vmatmul.bf16.gmra.mxu0 %v1371_v1  ;;  %725 = vmatmul.bf16.gmra.mxu2 %v1499_v2 }
 0x11d   :  { %1813 = vst [vmem:[#allocation7 + $0x30] sm:$0xff] %v1681_v12   ;;  %v1017_v14 = vadd.f32 %v1994_v3, %v950_v13  ;;  %814 = vmatmul.bf16.gmra.mxu1 %v1375_v4  ;;  %894 = vmatmul.bf16.gmra.mxu3 %v1503_v9  ;;  %v919_v21 = vmul.f32 %v1988_v63, %v776_v15 }
 0x11f   :  { %v1081_v17 = vmax.f32 %v1017_v14, 0.0  ;;  %v686_v18 = vpop.f32.mrf.mxu2  ;;  %v986_v26 = vadd.f32 %v1994_v3, %v919_v21 }
 0x120   :  { %v855_v19 = vpop.f32.mrf.mxu3 }
 0x121   :  { %v1761_v20 = vpack.c.bf16 %v1081_v17, %v1080_v16  ;;  %v608_v22 = vpop.f32.mrf.mxu0  ;;  %v856_v24 = vadd.f32 %v855_v19, %v686_v18  ;;  %v1050_v32 = vmax.f32 %v986_v26, 0.0 }
 0x122   :  { %v777_v23 = vpop.f32.mrf.mxu1 }
 0x123   :  { %1829 = vst [vmem:[#allocation7 + $0xb0] sm:$0xff] %v1761_v20   ;;  %v778_v25 = vadd.f32 %v777_v23, %v608_v22  ;;  %v951_v28 = vmul.f32 %v1988_v63, %v856_v24 }
 0x125   :  { %v920_v27 = vmul.f32 %v1988_v63, %v778_v25  ;;  %v1018_v37 = vadd.f32 %v1994_v3, %v951_v28 }
 0x127   :  { %v987_v29 = vadd.f32 %v1994_v3, %v920_v27  ;;  %v688_v30 = vpop.f32.mrf.mxu2  ;;  %v1082_v42 = vmax.f32 %v1018_v37, 0.0 }
 0x128   :  { %v857_v31 = vpop.f32.mrf.mxu3 }
 0x129   :  { %v1051_v33 = vmax.f32 %v987_v29, 0.0  ;;  %v858_v34 = vadd.f32 %v857_v31, %v688_v30  ;;  %v611_v35 = vpop.f32.mrf.mxu0 }
 0x12a   :  { %v780_v36 = vpop.f32.mrf.mxu1 }
 0x12b   :  { %v1686_v38 = vpack.c.bf16 %v1051_v33, %v1050_v32  ;;  %v952_v39 = vmul.f32 %v1988_v63, %v858_v34  ;;  %v781_v41 = vadd.f32 %v780_v36, %v611_v35 }
 0x12d   :  { %1814 = vst [vmem:[#allocation7 + $0x38] sm:$0xff] %v1686_v38   ;;  %v1019_v40 = vadd.f32 %v1994_v3, %v952_v39  ;;  %v921_v47 = vmul.f32 %v1988_v63, %v781_v41 }
 0x12f   :  { %v1083_v43 = vmax.f32 %v1019_v40, 0.0  ;;  %v691_v44 = vpop.f32.mrf.mxu2  ;;  %v988_v52 = vadd.f32 %v1994_v3, %v921_v47 }
 0x130   :  { %v860_v45 = vpop.f32.mrf.mxu3 }
 0x131   :  { %v1766_v46 = vpack.c.bf16 %v1083_v43, %v1082_v42  ;;  %v613_v48 = vpop.f32.mrf.mxu0  ;;  %v861_v50 = vadd.f32 %v860_v45, %v691_v44  ;;  %v1052_v58 = vmax.f32 %v988_v52, 0.0 }
 0x132   :  { %v782_v49 = vpop.f32.mrf.mxu1 }
 0x133   :  { %1830 = vst [vmem:[#allocation7 + $0xb8] sm:$0xff] %v1766_v46   ;;  %v783_v51 = vadd.f32 %v782_v49, %v613_v48  ;;  %v953_v54 = vmul.f32 %v1988_v63, %v861_v50 }
 0x135   :  { %v922_v53 = vmul.f32 %v1988_v63, %v783_v51  ;;  %v1020_v0 = vadd.f32 %v1994_v3, %v953_v54 }
 0x137   :  { %v989_v55 = vadd.f32 %v1994_v3, %v922_v53  ;;  %v693_v56 = vpop.f32.mrf.mxu2  ;;  %v1084_v6 = vmax.f32 %v1020_v0, 0.0 }
 0x138   :  { %v862_v57 = vpop.f32.mrf.mxu3 }
 0x139   :  { %v1053_v59 = vmax.f32 %v989_v55, 0.0  ;;  %v863_v60 = vadd.f32 %v862_v57, %v693_v56  ;;  %v616_v61 = vpop.f32.mrf.mxu0 }
 0x13a   :  { %v785_v62 = vpop.f32.mrf.mxu1 }
 0x13b   :  { %v1691_v1 = vpack.c.bf16 %v1053_v59, %v1052_v58  ;;  %v954_v2 = vmul.f32 %v1988_v63, %v863_v60  ;;  %v786_v5 = vadd.f32 %v785_v62, %v616_v61 }
 0x13d   :  { %1815 = vst [vmem:[#allocation7 + $0x40] sm:$0xff] %v1691_v1   ;;  %v1021_v4 = vadd.f32 %v1994_v3, %v954_v2  ;;  %v923_v11 = vmul.f32 %v1988_v63, %v786_v5 }
 0x13f   :  { %v1085_v7 = vmax.f32 %v1021_v4, 0.0  ;;  %v696_v8 = vpop.f32.mrf.mxu2  ;;  %v990_v16 = vadd.f32 %v1994_v3, %v923_v11 }
 0x140   :  { %v865_v9 = vpop.f32.mrf.mxu3 }
 0x141   :  { %v1771_v10 = vpack.c.bf16 %v1085_v7, %v1084_v6  ;;  %v618_v12 = vpop.f32.mrf.mxu0  ;;  %v866_v14 = vadd.f32 %v865_v9, %v696_v8  ;;  %v1054_v22 = vmax.f32 %v990_v16, 0.0 }
 0x142   :  { %v787_v13 = vpop.f32.mrf.mxu1 }
 0x143   :  { %1831 = vst [vmem:[#allocation7 + $0xc0] sm:$0xff] %v1771_v10   ;;  %v788_v15 = vadd.f32 %v787_v13, %v618_v12  ;;  %v955_v18 = vmul.f32 %v1988_v63, %v866_v14 }
 0x145   :  { %v924_v17 = vmul.f32 %v1988_v63, %v788_v15  ;;  %v1022_v27 = vadd.f32 %v1994_v3, %v955_v18 }
 0x147   :  { %v991_v19 = vadd.f32 %v1994_v3, %v924_v17  ;;  %v698_v20 = vpop.f32.mrf.mxu2  ;;  %v1086_v32 = vmax.f32 %v1022_v27, 0.0 }
 0x148   :  { %v867_v21 = vpop.f32.mrf.mxu3 }
 0x149   :  { %v1055_v23 = vmax.f32 %v991_v19, 0.0  ;;  %v868_v24 = vadd.f32 %v867_v21, %v698_v20  ;;  %v621_v25 = vpop.f32.mrf.mxu0 }
 0x14a   :  { %v790_v26 = vpop.f32.mrf.mxu1 }
 0x14b   :  { %v1696_v28 = vpack.c.bf16 %v1055_v23, %v1054_v22  ;;  %v956_v29 = vmul.f32 %v1988_v63, %v868_v24  ;;  %v791_v31 = vadd.f32 %v790_v26, %v621_v25 }
 0x14d   :  { %1816 = vst [vmem:[#allocation7 + $0x48] sm:$0xff] %v1696_v28   ;;  %v1023_v30 = vadd.f32 %v1994_v3, %v956_v29  ;;  %v925_v37 = vmul.f32 %v1988_v63, %v791_v31 }
 0x14f   :  { %v1087_v33 = vmax.f32 %v1023_v30, 0.0  ;;  %v701_v34 = vpop.f32.mrf.mxu2  ;;  %v992_v42 = vadd.f32 %v1994_v3, %v925_v37 }
 0x150   :  { %v870_v35 = vpop.f32.mrf.mxu3 }
 0x151   :  { %v1776_v36 = vpack.c.bf16 %v1087_v33, %v1086_v32  ;;  %v623_v38 = vpop.f32.mrf.mxu0  ;;  %v871_v40 = vadd.f32 %v870_v35, %v701_v34  ;;  %v1056_v48 = vmax.f32 %v992_v42, 0.0 }
 0x152   :  { %v792_v39 = vpop.f32.mrf.mxu1 }
 0x153   :  { %1832 = vst [vmem:[#allocation7 + $0xc8] sm:$0xff] %v1776_v36   ;;  %v793_v41 = vadd.f32 %v792_v39, %v623_v38  ;;  %v957_v44 = vmul.f32 %v1988_v63, %v871_v40 }
 0x155   :  { %v926_v43 = vmul.f32 %v1988_v63, %v793_v41  ;;  %v1024_v53 = vadd.f32 %v1994_v3, %v957_v44 }
 0x157   :  { %v993_v45 = vadd.f32 %v1994_v3, %v926_v43  ;;  %v703_v46 = vpop.f32.mrf.mxu2  ;;  %v1088_v58 = vmax.f32 %v1024_v53, 0.0 }
 0x158   :  { %v872_v47 = vpop.f32.mrf.mxu3 }
 0x159   :  { %v1057_v49 = vmax.f32 %v993_v45, 0.0  ;;  %v873_v50 = vadd.f32 %v872_v47, %v703_v46  ;;  %v626_v51 = vpop.f32.mrf.mxu0 }
 0x15a   :  { %v795_v52 = vpop.f32.mrf.mxu1 }
 0x15b   :  { %v1701_v54 = vpack.c.bf16 %v1057_v49, %v1056_v48  ;;  %v958_v55 = vmul.f32 %v1988_v63, %v873_v50  ;;  %v796_v57 = vadd.f32 %v795_v52, %v626_v51 }
 0x15d   :  { %1817 = vst [vmem:[#allocation7 + $0x50] sm:$0xff] %v1701_v54   ;;  %v1025_v56 = vadd.f32 %v1994_v3, %v958_v55  ;;  %v927_v0 = vmul.f32 %v1988_v63, %v796_v57 }
 0x15f   :  { %v1089_v59 = vmax.f32 %v1025_v56, 0.0  ;;  %v706_v60 = vpop.f32.mrf.mxu2  ;;  %v994_v6 = vadd.f32 %v1994_v3, %v927_v0 }
 0x160   :  { %v875_v61 = vpop.f32.mrf.mxu3 }
 0x161   :  { %v1781_v62 = vpack.c.bf16 %v1089_v59, %v1088_v58  ;;  %v628_v1 = vpop.f32.mrf.mxu0  ;;  %v876_v4 = vadd.f32 %v875_v61, %v706_v60  ;;  %v1058_v12 = vmax.f32 %v994_v6, 0.0 }
 0x162   :  { %v797_v2 = vpop.f32.mrf.mxu1 }
 0x163   :  { %1833 = vst [vmem:[#allocation7 + $0xd0] sm:$0xff] %v1781_v62   ;;  %v798_v5 = vadd.f32 %v797_v2, %v628_v1  ;;  %v959_v8 = vmul.f32 %v1988_v63, %v876_v4 }
 0x165   :  { %v928_v7 = vmul.f32 %v1988_v63, %v798_v5  ;;  %v1026_v17 = vadd.f32 %v1994_v3, %v959_v8 }
 0x167   :  { %v995_v9 = vadd.f32 %v1994_v3, %v928_v7  ;;  %v708_v10 = vpop.f32.mrf.mxu2  ;;  %v1090_v22 = vmax.f32 %v1026_v17, 0.0 }
 0x168   :  { %v877_v11 = vpop.f32.mrf.mxu3 }
 0x169   :  { %v1059_v13 = vmax.f32 %v995_v9, 0.0  ;;  %v878_v14 = vadd.f32 %v877_v11, %v708_v10  ;;  %v631_v15 = vpop.f32.mrf.mxu0 }
 0x16a   :  { %v800_v16 = vpop.f32.mrf.mxu1 }
 0x16b   :  { %v1706_v18 = vpack.c.bf16 %v1059_v13, %v1058_v12  ;;  %v960_v19 = vmul.f32 %v1988_v63, %v878_v14  ;;  %v801_v21 = vadd.f32 %v800_v16, %v631_v15 }
 0x16d   :  { %1818 = vst [vmem:[#allocation7 + $0x58] sm:$0xff] %v1706_v18   ;;  %v1027_v20 = vadd.f32 %v1994_v3, %v960_v19  ;;  %v929_v27 = vmul.f32 %v1988_v63, %v801_v21 }
 0x16f   :  { %v1091_v23 = vmax.f32 %v1027_v20, 0.0  ;;  %v711_v24 = vpop.f32.mrf.mxu2  ;;  %v996_v32 = vadd.f32 %v1994_v3, %v929_v27 }
 0x170   :  { %v880_v25 = vpop.f32.mrf.mxu3 }
 0x171   :  { %v1786_v26 = vpack.c.bf16 %v1091_v23, %v1090_v22  ;;  %v633_v28 = vpop.f32.mrf.mxu0  ;;  %v881_v30 = vadd.f32 %v880_v25, %v711_v24  ;;  %v1060_v38 = vmax.f32 %v996_v32, 0.0  ;;  %v1864_v23 = vld [vmem:[%s2123_s2] ss:$0 sm:$0xff]  ;;  %s1950_s2 = smov [#allocation7]  }
 0x172   :  { %v802_v29 = vpop.f32.mrf.mxu1 }
 0x173   :  { %1834 = vst [vmem:[#allocation7 + $0xd8] sm:$0xff] %v1786_v26   ;;  %v803_v31 = vadd.f32 %v802_v29, %v633_v28  ;;  %v961_v34 = vmul.f32 %v1988_v63, %v881_v30  ;;  %v1865_v26 = vld [vmem:[%s2124_s3] ss:$0 sm:$0xff]  ;;  %s1232_s3 = sshll.u32 %s1950_s2, 4  ;;  %s1233_s3 = int_to_ptr.vmem [resolvable:$true] %s1232_s3 }
 0x175   :  { %v930_v33 = vmul.f32 %v1988_v63, %v803_v31  ;;  %v1028_v43 = vadd.f32 %v1994_v3, %v961_v34 }
 0x177   :  { %v997_v35 = vadd.f32 %v1994_v3, %v930_v33  ;;  %v713_v36 = vpop.f32.mrf.mxu2  ;;  %v1092_v48 = vmax.f32 %v1028_v43, 0.0 }
 0x178   :  { %v882_v37 = vpop.f32.mrf.mxu3 }
 0x179   :  { %v1061_v39 = vmax.f32 %v997_v35, 0.0  ;;  %v883_v40 = vadd.f32 %v882_v37, %v713_v36  ;;  %v636_v41 = vpop.f32.mrf.mxu0 }
 0x17a   :  { %v805_v42 = vpop.f32.mrf.mxu1 }
 0x17b   :  { %v1711_v44 = vpack.c.bf16 %v1061_v39, %v1060_v38  ;;  %v962_v45 = vmul.f32 %v1988_v63, %v883_v40  ;;  %v806_v47 = vadd.f32 %v805_v42, %v636_v41 }
 0x17d   :  { %1819 = vst [vmem:[#allocation7 + $0x60] sm:$0xff] %v1711_v44   ;;  %v1029_v46 = vadd.f32 %v1994_v3, %v962_v45  ;;  %v931_v53 = vmul.f32 %v1988_v63, %v806_v47 }
 0x17f   :  { %v1093_v49 = vmax.f32 %v1029_v46, 0.0  ;;  %v716_v50 = vpop.f32.mrf.mxu2  ;;  %v998_v58 = vadd.f32 %v1994_v3, %v931_v53 }
 0x180   :  { %v885_v51 = vpop.f32.mrf.mxu3 }
 0x181   :  { %v1791_v52 = vpack.c.bf16 %v1093_v49, %v1092_v48  ;;  %v638_v54 = vpop.f32.mrf.mxu0  ;;  %v886_v56 = vadd.f32 %v885_v51, %v716_v50  ;;  %v1062_v1 = vmax.f32 %v998_v58, 0.0 }
 0x182   :  { %v807_v55 = vpop.f32.mrf.mxu1 }
 0x183   :  { %1835 = vst [vmem:[#allocation7 + $0xe0] sm:$0xff] %v1791_v52   ;;  %v808_v57 = vadd.f32 %v807_v55, %v638_v54  ;;  %v963_v60 = vmul.f32 %v1988_v63, %v886_v56 }
 0x185   :  { %v932_v59 = vmul.f32 %v1988_v63, %v808_v57  ;;  %v1030_v7 = vadd.f32 %v1994_v3, %v963_v60 }
 0x187   :  { %v999_v61 = vadd.f32 %v1994_v3, %v932_v59  ;;  %v718_v62 = vpop.f32.mrf.mxu2  ;;  %v1094_v12 = vmax.f32 %v1030_v7, 0.0 }
 0x188   :  { %v887_v0 = vpop.f32.mrf.mxu3 }
 0x189   :  { %v1063_v2 = vmax.f32 %v999_v61, 0.0  ;;  %v888_v4 = vadd.f32 %v887_v0, %v718_v62  ;;  %v641_v5 = vpop.f32.mrf.mxu0 }
 0x18a   :  { %v810_v6 = vpop.f32.mrf.mxu1 }
 0x18b   :  { %v1716_v8 = vpack.c.bf16 %v1063_v2, %v1062_v1  ;;  %v964_v9 = vmul.f32 %v1988_v63, %v888_v4  ;;  %v811_v11 = vadd.f32 %v810_v6, %v641_v5 }
 0x18d   :  { %1820 = vst [vmem:[#allocation7 + $0x68] sm:$0xff] %v1716_v8   ;;  %v1031_v10 = vadd.f32 %v1994_v3, %v964_v9  ;;  %v933_v17 = vmul.f32 %v1988_v63, %v811_v11 }
 0x18f   :  { %v1095_v13 = vmax.f32 %v1031_v10, 0.0  ;;  %v721_v14 = vpop.f32.mrf.mxu2  ;;  %v1000_v22 = vadd.f32 %v1994_v3, %v933_v17 }
 0x190   :  { %v890_v15 = vpop.f32.mrf.mxu3 }
 0x191   :  { %v1796_v16 = vpack.c.bf16 %v1095_v13, %v1094_v12  ;;  %v643_v18 = vpop.f32.mrf.mxu0  ;;  %v891_v20 = vadd.f32 %v890_v15, %v721_v14  ;;  %v1064_v29 = vmax.f32 %v1000_v22, 0.0 }
 0x192   :  { %v812_v19 = vpop.f32.mrf.mxu1 }
 0x193   :  { %1836 = vst [vmem:[#allocation7 + $0xe8] sm:$0xff] %v1796_v16   ;;  %v813_v21 = vadd.f32 %v812_v19, %v643_v18  ;;  %v965_v25 = vmul.f32 %v1864_v23, %v891_v20 }
 0x195   :  { %v934_v24 = vmul.f32 %v1864_v23, %v813_v21  ;;  %v1032_v34 = vadd.f32 %v1865_v26, %v965_v25 }
 0x197   :  { %v1001_v27 = vadd.f32 %v1865_v26, %v934_v24  ;;  %v723_v28 = vpop.f32.mrf.mxu2  ;;  %v1096_v38 = vmax.f32 %v1032_v34, 0.0 }
 0x198   :  { %v892_v63 = vpop.f32.mrf.mxu3 }
 0x199   :  { %v1065_v30 = vmax.f32 %v1001_v27, 0.0  ;;  %v893_v31 = vadd.f32 %v892_v63, %v723_v28  ;;  %v646_v32 = vpop.f32.mrf.mxu0 }
 0x19a   :  { %v815_v33 = vpop.f32.mrf.mxu1 }
 0x19b   :  { %v1721_v3 = vpack.c.bf16 %v1065_v30, %v1064_v29  ;;  %v966_v35 = vmul.f32 %v1864_v23, %v893_v31  ;;  %v816_v37 = vadd.f32 %v815_v33, %v646_v32 }
 0x19d   :  { %1821 = vst [vmem:[#allocation7 + $0x70] sm:$0xff] %v1721_v3   ;;  %v1033_v36 = vadd.f32 %v1865_v26, %v966_v35  ;;  %v935_v43 = vmul.f32 %v1864_v23, %v816_v37 }
 0x19f   :  { %v1097_v39 = vmax.f32 %v1033_v36, 0.0  ;;  %v726_v40 = vpop.f32.mrf.mxu2  ;;  %v1002_v48 = vadd.f32 %v1865_v26, %v935_v43 }
 0x1a0   :  { %v895_v41 = vpop.f32.mrf.mxu3 }
 0x1a1   :  { %v1801_v42 = vpack.c.bf16 %v1097_v39, %v1096_v38  ;;  %v648_v44 = vpop.f32.mrf.mxu0  ;;  %v896_v46 = vadd.f32 %v895_v41, %v726_v40  ;;  %v1066_v54 = vmax.f32 %v1002_v48, 0.0 }
 0x1a2   :  { %v817_v45 = vpop.f32.mrf.mxu1 }
 0x1a3   :  { %1837 = vst [vmem:[#allocation7 + $0xf0] sm:$0xff] %v1801_v42   ;;  %v818_v47 = vadd.f32 %v817_v45, %v648_v44  ;;  %v967_v50 = vmul.f32 %v1864_v23, %v896_v46 }
 0x1a5   :  { %v936_v49 = vmul.f32 %v1864_v23, %v818_v47  ;;  %v1034_v57 = vadd.f32 %v1865_v26, %v967_v50 }
 0x1a7   :  { %v1003_v51 = vadd.f32 %v1865_v26, %v936_v49  ;;  %v728_v52 = vpop.f32.mrf.mxu2  ;;  %v1098_v61 = vmax.f32 %v1034_v57, 0.0 }
 0x1a8   :  { %v897_v53 = vpop.f32.mrf.mxu3 }
 0x1a9   :  { %v1067_v55 = vmax.f32 %v1003_v51, 0.0  ;;  %v898_v56 = vadd.f32 %v897_v53, %v728_v52 }
 0x1ab   :  { %v1726_v58 = vpack.c.bf16 %v1067_v55, %v1066_v54  ;;  %v968_v59 = vmul.f32 %v1864_v23, %v898_v56 }
 0x1ad   :  { %1822 = vst [vmem:[#allocation7 + $0x78] sm:$0xff] %v1726_v58   ;;  %v1035_v60 = vadd.f32 %v1865_v26, %v968_v59 }
 0x1af   :  { %v1099_v62 = vmax.f32 %v1035_v60, 0.0 }
 0x1b1   :  { %v1806_v0 = vpack.c.bf16 %v1099_v62, %v1098_v61 }
 0x1b3   :  { %1838 = vst [vmem:[#allocation7 + $0xf8] sm:$0xff] %v1806_v0  }
 0x1b4   :  { %1240 = dma.vmem_to_hbm [thread:$0]  %s1233_s3, 4096, %s1235_s11, [#allocation4], %s1948_s27, %s1948_s27, %s1949_s28  }
 0x1b5   :  { %1942 = dma.done.wait [#allocation4], 4096  }
 0x1b6   :  { %1943 = vsyncadd [#allocation4], 4294963200 }
 0x1b7   :  { %1245 = vsyncpa [#allocation3], 1 }
 0x1b8   :  { %1246 = vsyncpa [#allocation6], 1 }
 0x1b9   :  { %1247 = vsyncpa [#allocation4], 1 }

</bundles_post_ra>
